<compile_context>
chip_gen: v7x
topology: tpu7x:2x2x1
jax: 0.10.0
libtpu: 0.0.40
codegen_flags: <defaults>
</compile_context>

<pallas_src>
import jax
import jax.numpy as jnp
from jax.experimental import pallas as pl
from jax.experimental.pallas import tpu as pltpu


def _round_up(x, m):
    return ((x + m - 1) // m) * m


def _vmem_capacity_bytes():
    try:
        info = pltpu.get_tpu_info()
        cap = getattr(info, "vmem_capacity_bytes", None)
        if cap:
            return int(cap)
    except Exception:
        pass
    return 64 * 1024 * 1024  # conservative fallback: v7x physical VMEM


def _head_kernel(x_ref, w_ref, o_ref, acc_ref):
    # x_ref  : (TB, HW, C)  feature tile, C lane-dense (bf16 or f32)
    # w_ref  : (C, Kpad)    fc weight pre-scaled by 1/HW (bf16), resident every step
    # o_ref  : (TB, Kpad)   f32 logits tile (bias added in the wrapper)
    # acc_ref: (TB, C)      f32 pooling accumulator (VMEM scratch)
    hw = x_ref.shape[1]
    itemsize = jnp.dtype(x_ref.dtype).itemsize
    ch = 8 * max(1, 4 // itemsize)       # one packed sublane tile per chunk (8 f32 / 16 bf16)
    n_full = hw // ch
    rem = hw - n_full * ch

    acc_ref[...] = jnp.zeros_like(acc_ref)

    if n_full > 0:
        @pl.loop(0, n_full)
        def _(i):
            start = pl.multiple_of(i * ch, ch)
            chunk = x_ref[:, pl.ds(start, ch), :]                       # (TB, ch, C)
            acc_ref[...] += jnp.sum(chunk.astype(jnp.float32), axis=1)  # only chunk is f32

    if rem > 0:
        tail = x_ref[:, n_full * ch:, :]
        acc_ref[...] += jnp.sum(tail.astype(jnp.float32), axis=1)

    # MXU: bf16 x bf16 with f32 accumulation (1/HW already folded into w).
    logits = jnp.dot(acc_ref[...].astype(w_ref.dtype), w_ref[...],
                     preferred_element_type=jnp.float32)
    o_ref[...] = logits.astype(o_ref.dtype)


def resnet_finetune_head(feats_nhwc, fc_w, fc_b, *, max_batch_tile=512):
    """Fused global-average-pool + linear classifier head.

    feats_nhwc : (B, H, W, C) backbone feature maps, NHWC, any float dtype
                 (bf16 recommended: the kernel is HBM-bandwidth bound).
    fc_w       : (C, K) linear weight (stored transposed vs torch's (K, C)).
    fc_b       : (K,)   linear bias.
    returns    : (B, K) float32 logits.
    """
    B, H, W, C = feats_nhwc.shape
    HW = H * W
    K = fc_w.shape[1]
    Kpad = _round_up(K, 128)             # lane-dense output / weight last dim

    # Free reshape (NHWC is already contiguous as (B, HW, C)); no HBM transpose.
    x = feats_nhwc.reshape(B, HW, C)
    feat_itemsize = jnp.dtype(x.dtype).itemsize

    # Weight prep (once): fold 1/HW, cast to bf16 for the MXU, pad K to 128.
    w = (fc_w.astype(jnp.float32) * (1.0 / HW)).astype(jnp.bfloat16)
    if Kpad != K:
        w = jnp.pad(w, ((0, 0), (0, Kpad - K)))

    # ---- generation-aware batch tile / VMEM budget ---------------------------
    vmem_cap = _vmem_capacity_bytes()
    big_vmem = vmem_cap >= 100 * 1024 * 1024           # v5e / v6e (128 MiB parts)
    n_feat_buf = 3 if big_vmem else 2                  # extra feature buffer when roomy

    sub_mult = 8 * max(1, 4 // feat_itemsize)          # sublane packing (8 f32 / 16 bf16)
    hw_pad = _round_up(HW, sub_mult)                   # padded HW inside VMEM buffers
    c_lane = _round_up(C, 128)
    ch = sub_mult                                      # in-kernel pooling chunk

    # Per-batch-row VMEM: DMA feature buffers (padding-aware) + in-kernel f32
    # chunk/accumulator intermediates + logits temp + double-buffered f32 output rows.
    per_row = (n_feat_buf * hw_pad * c_lane * feat_itemsize
               + (ch + 2) * c_lane * 4
               + 3 * Kpad * 4)
    w_bytes = _round_up(C, 16) * Kpad * 2
    fixed = 2 * w_bytes                                # budget 2 weight buffers even if 1 requested
    budget = int(vmem_cap * 0.72)                      # headroom for Mosaic internal scratch

    tb_cap = max(8, (budget - fixed) // per_row)
    tb_cap = min(tb_cap, max_batch_tile)
    if B <= tb_cap:
        TB, Bp = B, B                                  # whole batch in one grid step
    else:
        TB = max(8, (tb_cap // 8) * 8)                 # multiple of 8 -> clean (8,128) blocks
        Bp = _round_up(B, TB)
        x = jnp.pad(x, ((0, Bp - B), (0, 0), (0, 0)))

    num_steps = Bp // TB
    grid = (num_steps,)

    vmem_need = fixed + TB * per_row
    vmem_limit = int(min(max(vmem_need * 5 // 4, 16 * 1024 * 1024),
                         int(vmem_cap * 0.9)))

    # Advisory cost: pooling adds + matmul flops; HBM traffic is feature-dominated.
    flops = int(2 * Bp * C * Kpad + Bp * C * HW)
    bytes_accessed = int(Bp * HW * C * feat_itemsize + C * Kpad * 2 + Bp * Kpad * 4)

    def _spec(shape, imap, mode):
        if mode is None:
            return pl.BlockSpec(shape, imap)
        return pl.BlockSpec(shape, imap, pipeline_mode=mode)

    def _call(use_pipeline_hints):
        feat_mode = (pl.Buffered(3)
                     if (use_pipeline_hints and big_vmem and num_steps >= 4) else None)
        w_mode = pl.Buffered(1) if use_pipeline_hints else None   # grid-invariant block
        return pl.pallas_call(
            _head_kernel,
            out_shape=jax.ShapeDtypeStruct((Bp, Kpad), jnp.float32),
            grid=grid,
            in_specs=[
                _spec((TB, HW, C), lambda b: (b, 0, 0), feat_mode),   # streamed features
                _spec((C, Kpad), lambda b: (0, 0), w_mode),           # resident weight
            ],
            out_specs=pl.BlockSpec((TB, Kpad), lambda b: (b, 0)),
            scratch_shapes=[pltpu.VMEM((TB, C), jnp.float32)],
            compiler_params=pltpu.CompilerParams(
                dimension_semantics=("parallel",),                    # batch tiles independent
                vmem_limit_bytes=vmem_limit),
            cost_estimate=pl.CostEstimate(
                flops=flops, transcendentals=0, bytes_accessed=bytes_accessed),
        )(x, w)

    try:
        out = _call(True)        # single-buffered weight / deeper feature pipeline
    except Exception:
        out = _call(False)       # installed Pallas rejected pipeline_mode hints

    # Bias folded out of the kernel: one cheap fused XLA add, then unpad.
    return out[:B, :K] + fc_b.astype(jnp.float32)


def _reference(feats_nhwc, fc_w, fc_b):
    pooled = jnp.mean(feats_nhwc.astype(jnp.float32), axis=(1, 2))      # (B, C)
    return pooled @ fc_w.astype(jnp.float32) + fc_b.astype(jnp.float32)


if __name__ == "__main__":
    key = jax.random.PRNGKey(0)
    k_x, k_w, k_b = jax.random.split(key, 3)

    # Small, shape-consistent stand-in for resnet50's final feature map
    # (real model: (B, 7, 7, 2048) NHWC).  Here: (2, 8, 8, 128), 10 classes.
    B, H, W, C = 2, 8, 8, 128
    num_classes = 10

    feats_f32 = jax.random.normal(k_x, (B, H, W, C), dtype=jnp.float32)
    feats = feats_f32.astype(jnp.bfloat16)          # stream features in bf16

    # Deterministic fc init (the "fresh_params" finetune head), stored as (C, K).
    fc_w = (jax.random.normal(k_w, (C, num_classes), dtype=jnp.float32)
            * (1.0 / jnp.sqrt(C))).astype(jnp.bfloat16)
    fc_b = jax.random.normal(k_b, (num_classes,), dtype=jnp.float32) * 0.01

    out = jax.block_until_ready(resnet_finetune_head(feats, fc_w, fc_b))

    ref = _reference(feats, fc_w, fc_b)
    assert out.shape == (B, num_classes)
    # Tolerance covers bf16 MXU operands with f32 accumulation; semantics match.
    assert jnp.allclose(out, ref, atol=1e-2, rtol=1e-2), "mismatch vs reference"

    print("KERNEL_OK")
</pallas_src>

<mosaic_0001>
module attributes {stable_mosaic.version = 11 : i64} {
  func.func @_head_kernel(%arg0: i32, %arg1: memref<2x64x128xbf16, #tpu.memory_space<vmem>>, %arg2: memref<128x128xbf16, #tpu.memory_space<vmem>>, %arg3: memref<2x128xf32, #tpu.memory_space<vmem>>, %arg4: memref<2x128xf32, #tpu.memory_space<vmem>>) attributes {dimension_semantics = [#tpu.dimension_semantics<parallel>], iteration_bounds = array<i64: 1>, scalar_prefetch = 0 : i64, scratch_operands = 1 : i64, tpu.core_type = #tpu.core_type<tc>, window_params = [{transform_indices = @transform_0, window_bounds = array<i64: 2, 64, 128>}, {pipeline_mode = #tpu.pipeline_mode<synchronous>, transform_indices = @transform_1, window_bounds = array<i64: 128, 128>}, {transform_indices = @transform_2, window_bounds = array<i64: 2, 128>}]} {
    %cst = arith.constant 0.000000e+00 : f32
    %0 = vector.broadcast %cst : f32 to vector<2x128xf32>
    %c0 = arith.constant 0 : index
    %c0_0 = arith.constant 0 : index
    %1 = vector.load %arg4[%c0, %c0_0] : memref<2x128xf32, #tpu.memory_space<vmem>>, vector<2x128xf32>
    tpu.vector_store %arg4[%c0, %c0_0], %0 {strides = array<i32>} : memref<2x128xf32, #tpu.memory_space<vmem>>, vector<2x128xf32>,
    %c0_i32 = arith.constant 0 : i32
    %c4_i32 = arith.constant 4 : i32
    %2 = arith.addi %c0_i32, %c4_i32 : i32
    %c1_i32 = arith.constant 1 : i32
    scf.for %arg5 = %c0_i32 to %2 step %c1_i32  : i32 {
      %c1_i32_9 = arith.constant 1 : i32
      %8 = arith.muli %arg5, %c1_i32_9 : i32
      %c0_i32_10 = arith.constant 0 : i32
      %9 = arith.addi %c0_i32_10, %8 : i32
      %c16_i32 = arith.constant 16 : i32
      %10 = arith.muli %9, %c16_i32 : i32
      %11 = tpu.assume_multiple %10, 16 : i32
      %c0_11 = arith.constant 0 : index
      %12 = arith.index_cast %11 : i32 to index
      %c0_12 = arith.constant 0 : index
      %13 = vector.load %arg1[%c0_11, %12, %c0_12] : memref<2x64x128xbf16, #tpu.memory_space<vmem>>, vector<2x16x128xbf16>
      %c0_13 = arith.constant 0 : index
      %c0_14 = arith.constant 0 : index
      %14 = vector.load %arg4[%c0_13, %c0_14] : memref<2x128xf32, #tpu.memory_space<vmem>>, vector<2x128xf32>
      %15 = arith.extf %13 : vector<2x16x128xbf16> to vector<2x16x128xf32>
      %cst_15 = arith.constant dense<0.000000e+00> : vector<2x128xf32>
      %16 = vector.multi_reduction <add>, %15, %cst_15 [1] : vector<2x16x128xf32> to vector<2x128xf32>
      %17 = arith.addf %14, %16 : vector<2x128xf32>
      %c0_16 = arith.constant 0 : index
      %c0_17 = arith.constant 0 : index
      %18 = vector.load %arg4[%c0_16, %c0_17] : memref<2x128xf32, #tpu.memory_space<vmem>>, vector<2x128xf32>
      tpu.vector_store %arg4[%c0_16, %c0_17], %17 {strides = array<i32>} : memref<2x128xf32, #tpu.memory_space<vmem>>, vector<2x128xf32>,
    }
    %c4_i32_1 = arith.constant 4 : i32
    %c0_2 = arith.constant 0 : index
    %c0_3 = arith.constant 0 : index
    %3 = vector.load %arg4[%c0_2, %c0_3] : memref<2x128xf32, #tpu.memory_space<vmem>>, vector<2x128xf32>
    %4 = arith.truncf %3 : vector<2x128xf32> to vector<2x128xbf16>
    %c0_4 = arith.constant 0 : index
    %c0_5 = arith.constant 0 : index
    %5 = vector.load %arg2[%c0_4, %c0_5] : memref<128x128xbf16, #tpu.memory_space<vmem>>, vector<128x128xbf16>
    %cst_6 = arith.constant dense<0.000000e+00> : vector<2x128xf32>
    %6 = tpu.matmul %4, %5, %cst_6 {dimension_numbers = #tpu.dot_dimension_numbers<[1], [0], [0], [1], [0, 0, 1, 1], [], []>} : vector<2x128xbf16>, vector<128x128xbf16>, vector<2x128xf32> -> vector<2x128xf32>
    %c0_7 = arith.constant 0 : index
    %c0_8 = arith.constant 0 : index
    %7 = vector.load %arg3[%c0_7, %c0_8] : memref<2x128xf32, #tpu.memory_space<vmem>>, vector<2x128xf32>
    tpu.vector_store %arg3[%c0_7, %c0_8], %6 {strides = array<i32>} : memref<2x128xf32, #tpu.memory_space<vmem>>, vector<2x128xf32>,
    return
  }
  func.func @transform_0(%arg0: i32) -> (i32, i32, i32) {
    %c0_i32 = arith.constant 0 : i32
    %c0_i32_0 = arith.constant 0 : i32
    %c0_i32_1 = arith.constant 0 : i32
    return %arg0, %c0_i32, %c0_i32_0 : i32, i32, i32
  }
  func.func @transform_1(%arg0: i32) -> (i32, i32) {
    %c0_i32 = arith.constant 0 : i32
    %c0_i32_0 = arith.constant 0 : i32
    %c0_i32_1 = arith.constant 0 : i32
    return %c0_i32, %c0_i32_0 : i32, i32
  }
  func.func @transform_2(%arg0: i32) -> (i32, i32) {
    %c0_i32 = arith.constant 0 : i32
    %c0_i32_0 = arith.constant 0 : i32
    return %arg0, %c0_i32 : i32, i32
  }
}

module attributes {stable_mosaic.version = 11 : i64} {
  func.func @_head_kernel(%arg0: i32, %arg1: memref<2x64x128xbf16, #tpu.memory_space<vmem>>, %arg2: memref<128x128xbf16, #tpu.memory_space<vmem>>, %arg3: memref<2x128xf32, #tpu.memory_space<vmem>>, %arg4: memref<2x128xf32, #tpu.memory_space<vmem>>) attributes {dimension_semantics = [#tpu.dimension_semantics<parallel>], iteration_bounds = array<i64: 1>, scalar_prefetch = 0 : i64, scratch_operands = 1 : i64, tpu.core_type = #tpu.core_type<tc>, window_params = [{transform_indices = @transform_0, window_bounds = array<i64: 2, 64, 128>}, {pipeline_mode = #tpu.pipeline_mode<synchronous>, transform_indices = @transform_1, window_bounds = array<i64: 128, 128>}, {transform_indices = @transform_2, window_bounds = array<i64: 2, 128>}]} {
    %cst = arith.constant 0.000000e+00 : f32
    %0 = vector.broadcast %cst : f32 to vector<2x128xf32>
    %c0 = arith.constant 0 : index
    %c0_0 = arith.constant 0 : index
    %1 = vector.load %arg4[%c0, %c0_0] : memref<2x128xf32, #tpu.memory_space<vmem>>, vector<2x128xf32>
    tpu.vector_store %arg4[%c0, %c0_0], %0 {strides = array<i32>} : memref<2x128xf32, #tpu.memory_space<vmem>>, vector<2x128xf32>,
    %c0_i32 = arith.constant 0 : i32
    %c4_i32 = arith.constant 4 : i32
    %2 = arith.addi %c0_i32, %c4_i32 : i32
    %c1_i32 = arith.constant 1 : i32
    scf.for %arg5 = %c0_i32 to %2 step %c1_i32  : i32 {
      %c1_i32_9 = arith.constant 1 : i32
      %8 = arith.muli %arg5, %c1_i32_9 : i32
      %c0_i32_10 = arith.constant 0 : i32
      %9 = arith.addi %c0_i32_10, %8 : i32
      %c16_i32 = arith.constant 16 : i32
      %10 = arith.muli %9, %c16_i32 : i32
      %11 = tpu.assume_multiple %10, 16 : i32
      %c0_11 = arith.constant 0 : index
      %12 = arith.index_cast %11 : i32 to index
      %c0_12 = arith.constant 0 : index
      %13 = vector.load %arg1[%c0_11, %12, %c0_12] : memref<2x64x128xbf16, #tpu.memory_space<vmem>>, vector<2x16x128xbf16>
      %c0_13 = arith.constant 0 : index
      %c0_14 = arith.constant 0 : index
      %14 = vector.load %arg4[%c0_13, %c0_14] : memref<2x128xf32, #tpu.memory_space<vmem>>, vector<2x128xf32>
      %15 = arith.extf %13 : vector<2x16x128xbf16> to vector<2x16x128xf32>
      %cst_15 = arith.constant dense<0.000000e+00> : vector<2x128xf32>
      %16 = vector.multi_reduction <add>, %15, %cst_15 [1] : vector<2x16x128xf32> to vector<2x128xf32>
      %17 = arith.addf %14, %16 : vector<2x128xf32>
      %c0_16 = arith.constant 0 : index
      %c0_17 = arith.constant 0 : index
      %18 = vector.load %arg4[%c0_16, %c0_17] : memref<2x128xf32, #tpu.memory_space<vmem>>, vector<2x128xf32>
      tpu.vector_store %arg4[%c0_16, %c0_17], %17 {strides = array<i32>} : memref<2x128xf32, #tpu.memory_space<vmem>>, vector<2x128xf32>,
    }
    %c4_i32_1 = arith.constant 4 : i32
    %c0_2 = arith.constant 0 : index
    %c0_3 = arith.constant 0 : index
    %3 = vector.load %arg4[%c0_2, %c0_3] : memref<2x128xf32, #tpu.memory_space<vmem>>, vector<2x128xf32>
    %4 = arith.truncf %3 : vector<2x128xf32> to vector<2x128xbf16>
    %c0_4 = arith.constant 0 : index
    %c0_5 = arith.constant 0 : index
    %5 = vector.load %arg2[%c0_4, %c0_5] : memref<128x128xbf16, #tpu.memory_space<vmem>>, vector<128x128xbf16>
    %cst_6 = arith.constant dense<0.000000e+00> : vector<2x128xf32>
    %6 = tpu.matmul %4, %5, %cst_6 {dimension_numbers = #tpu.dot_dimension_numbers<[1], [0], [0], [1], [0, 0, 1, 1], [], []>} : vector<2x128xbf16>, vector<128x128xbf16>, vector<2x128xf32> -> vector<2x128xf32>
    %c0_7 = arith.constant 0 : index
    %c0_8 = arith.constant 0 : index
    %7 = vector.load %arg3[%c0_7, %c0_8] : memref<2x128xf32, #tpu.memory_space<vmem>>, vector<2x128xf32>
    tpu.vector_store %arg3[%c0_7, %c0_8], %6 {strides = array<i32>} : memref<2x128xf32, #tpu.memory_space<vmem>>, vector<2x128xf32>,
    return
  }
  func.func @transform_0(%arg0: i32) -> (i32, i32, i32) {
    %c0_i32 = arith.constant 0 : i32
    %c0_i32_0 = arith.constant 0 : i32
    %c0_i32_1 = arith.constant 0 : i32
    return %arg0, %c0_i32, %c0_i32_0 : i32, i32, i32
  }
  func.func @transform_1(%arg0: i32) -> (i32, i32) {
    %c0_i32 = arith.constant 0 : i32
    %c0_i32_0 = arith.constant 0 : i32
    %c0_i32_1 = arith.constant 0 : i32
    return %c0_i32, %c0_i32_0 : i32, i32
  }
  func.func @transform_2(%arg0: i32) -> (i32, i32) {
    %c0_i32 = arith.constant 0 : i32
    %c0_i32_0 = arith.constant 0 : i32
    return %arg0, %c0_i32 : i32, i32
  }
}

</mosaic_0001>

<bundles_post_ra>
// kernel: tpu_custom_call.1
= control target key start
LH: loop header
LB: loop body
LE: loop exit
PB: predicated region body
PF: predicated region fallthrough
CT: control target
= control target key end

     0   :  { %7 = vsyncpa [#allocation4], 0  ;;  %s441_s0 = inlined_call_operand.hbm [shape: bf16[2,64,128], index: 0, kind: input, shape index: {}]   ;;  %s442_s1 = inlined_call_operand.hbm [shape: bf16[128,128], index: 1, kind: input, shape index: {}]   ;;  %s443_s2 = inlined_call_operand.hbm [shape: f32[2,128], index: 2, kind: output, shape index: {}]  }
   0x1   :  { %8 = vsyncpa [#allocation7], 0 }
   0x2   :  { %9 = vsyncpa [#allocation5], 0  ;;  %s364_s9 = smov [#allocation3]   ;;  %s284_s13 = scalar_lea.hbm %s441_s0, 1024 }
   0x3   :  { %s15_s10 = sshll.u32 %s364_s9, 4  ;;  %p285_p0 = scmp.ne.s32.totalorder %s441_s0, %s284_s13  ;;  %s16_s10 = int_to_ptr.vmem [resolvable:$true] %s15_s10 }
   0x4   :  { %p288_p1 = scmp.lt.u32.totalorder %s284_s13, %s441_s0 }
   0x6   :  { %p290_p2 = pnand %p288_p1, %p285_p0 }
   0x8   :  { %293 = shalt.err (!%p290_p2)
}
   0x9   :  { %s294_s18 = scalar_lea.vmem %s16_s10, 1024  ;;  %p299_p4 = scmp.lt.s32.totalorder %s16_s10, %s16_s10 }
   0xa   :  { %p295_p3 = scmp.ne.s32.totalorder %s16_s10, %s294_s18  ;;  %p300_p5 = scmp.lt.s32.totalorder %s294_s18, %s294_s18 }
   0xc   :  { %p301_p6 = por %p300_p5, %p299_p4 }
   0xe   :  { %p302_p7 = pnand %p301_p6, %p295_p3 }
  0x10   :  { %305 = shalt.err (!%p302_p7)
}
  0x11   :  { %s365_s19 = smov 64   ;;  %s366_s20 = smov 4  }
  0x12   :  { %21 = dma.hbm_to_vmem [thread:$0]  %s441_s0, 1024, %s16_s10, [#allocation4], %s365_s19, %s365_s19, %s366_s20  }
  0x13   :  { %s367_s23 = smov [#allocation6]   ;;  %s306_s27 = scalar_lea.hbm %s442_s1, 1024 }
  0x14   :  { %s27_s24 = sshll.u32 %s367_s23, 4  ;;  %p307_p8 = scmp.ne.s32.totalorder %s442_s1, %s306_s27  ;;  %s28_s24 = int_to_ptr.vmem [resolvable:$true] %s27_s24 }
  0x15   :  { %p310_p9 = scmp.lt.u32.totalorder %s306_s27, %s442_s1 }
  0x17   :  { %p312_p10 = pnand %p310_p9, %p307_p8 }
  0x19   :  { %315 = shalt.err (!%p312_p10)
}
  0x1a   :  { %s316_s4 = scalar_lea.vmem %s28_s24, 1024  ;;  %p321_p12 = scmp.lt.s32.totalorder %s28_s24, %s28_s24 }
  0x1b   :  { %p317_p11 = scmp.ne.s32.totalorder %s28_s24, %s316_s4  ;;  %p322_p13 = scmp.lt.s32.totalorder %s316_s4, %s316_s4 }
  0x1d   :  { %p323_p0 = por %p322_p13, %p321_p12 }
  0x1f   :  { %p324_p1 = pnand %p323_p0, %p317_p11 }
  0x21   :  { %327 = shalt.err (!%p324_p1)
}
  0x22   :  { %33 = dma.hbm_to_vmem [thread:$0]  %s442_s1, 1024, %s28_s24, [#allocation7], %s365_s19, %s365_s19, %s366_s20  }
  0x23   :  { %354 = dma.done.wait [#allocation4], 1024  }
  0x24   :  { %355 = vsyncadd [#allocation4], 4294966272 }
  0x25   :  { %356 = dma.done.wait [#allocation7], 1024  }
  0x26   :  { %357 = vsyncadd [#allocation7], 4294966272  ;;  %v368_v0 = vmov 0.0   ;;  %s411_s6 = smov 0  }
  0x27   :  { %41 = vst [vmem:[#allocation2] sm:$0x3] %v368_v0 }
  0x28 LB: > { %s213_s7 = sshll.u32 %s362_s6, 4  ;;  %vm78_vm0 = vcmask 1041409   ;;  %s47_s6 = sadd.s32 1, %s362_s6   ;;  %s362_s6 = sphi %s411_s6, %s47_s6  }
  0x29   : > { %s49_s8 = sshra.s32 %s213_s7, 3  ;;  %p44_p2 = scmp.ge.s32.totalorder %s47_s6, 4  }
  0x2a   : > { %s214_s9 = sshll.u32 %s49_s8, 2  ;;  %241 = vmatprep.subr.bf16.mxu0 (%p44_p2), %v368_v0  ;;  %v276_v24 = vld [vmem:[#allocation6] sm:$0xff] (%p44_p2)   ;;  %vm369_vm1 = vmmov (%p44_p2), 0   ;;  %v277_v25 = vld [vmem:[#allocation6 + $0x8] sm:$0xff] (%p44_p2)   ;;  %v278_v26 = vld [vmem:[#allocation6 + $0x10] sm:$0xff] (%p44_p2)   ;;  %s370_s1 = smov (%p44_p2), [#allocation8]  }
  0x2b   : > { %s52_s10 = scalar_lea.vmem [#allocation3], %s214_s9  ;;  %257 = vmatprep.mubr.msk.bf16.mxu0 (%p44_p2), %vm369_vm1, %v368_v0  ;;  %242 = vmatpush3.bf16.msra.mxu0 (%p44_p2), %v276_v24  ;;  %v279_v27 = vld [vmem:[#allocation6 + $0x18] sm:$0xff] (%p44_p2)   ;;  %v280_v28 = vld [vmem:[#allocation6 + $0x20] sm:$0xff] (%p44_p2)   ;;  %v281_v29 = vld [vmem:[#allocation6 + $0x28] sm:$0xff] (%p44_p2)   ;;  %s196_s11 = sshll.u32 (%p44_p2), %s370_s1, 4  ;;  %s197_s11 = int_to_ptr.vmem [resolvable:$true] %s196_s11 }
  0x2c   : > { %v224_v1 = vld [vmem:[%s52_s10] sm:$0xff]   ;;  %243 = vmatprep.subr.bf16.mxu0 (%p44_p2), %v368_v0  ;;  %v282_v30 = vld [vmem:[#allocation6 + $0x30] sm:$0xff] (%p44_p2)   ;;  %s328_s12 = scalar_lea.vmem (%p44_p2), %s197_s11, 32  ;;  %p333_p4 = scmp.lt.s32.totalorder (%p44_p2), %s197_s11, %s197_s11 }
  0x2d   : > { %v231_v2 = vld [vmem:[%s52_s10 + $0x20] sm:$0xff]   ;;  %v225_v3 = vunpack.c.l.bf16 %v224_v1  ;;  %v226_v4 = vunpack.c.h.bf16 %v224_v1  ;;  %p329_p3 = scmp.ne.s32.totalorder (%p44_p2), %s197_s11, %s328_s12  ;;  %p334_p5 = scmp.lt.s32.totalorder (%p44_p2), %s328_s12, %s328_s12 }
  0x2e   : > { %v229_v5 = vunpack.c.l.bf16 %v231_v2  ;;  %v230_v6 = vunpack.c.h.bf16 %v231_v2  ;;  %v57_v19 = vld [vmem:[#allocation2] sm:$0x3] }
  0x2f   : > { %v62_v7 = vadd.f32 %v226_v4, %v225_v3  ;;  %244 = vmatpush3.bf16.msra.mxu0 (%p44_p2), %v277_v25  ;;  %v283_v31 = vld [vmem:[#allocation6 + $0x38] sm:$0xff] (%p44_p2)   ;;  %p335_p6 = por (%p44_p2), %p334_p5, %p333_p4 }
  0x30   : > { %v69_v8 = vadd.f32 %v230_v6, %v229_v5  ;;  %245 = vmatprep.subr.bf16.mxu0 (%p44_p2), %v368_v0 }
  0x31   : > { %v63_v9 = vrot.slane %v62_v7, 4  ;;  %p336_p7 = pnand (%p44_p2), %p335_p6, %p329_p3 }
  0x32   : > { %v70_v10 = vrot.slane %v69_v8, 4 }
  0x33   : > { %v64_v11 = vadd.f32 %v63_v9, %v62_v7  ;;  %246 = vmatpush3.bf16.msra.mxu0 (%p44_p2), %v278_v26 }
  0x34   : > { %v71_v12 = vadd.f32 %v70_v10, %v69_v8  ;;  %247 = vmatprep.subr.bf16.mxu0 (%p44_p2), %v368_v0 }
  0x35   : > { %v65_v13 = vrot.slane %v64_v11, 2 }
  0x36   : > { %v72_v14 = vrot.slane %v71_v12, 2 }
  0x37   : > { %v66_v15 = vadd.f32 %v65_v13, %v64_v11  ;;  %248 = vmatpush3.bf16.msra.mxu0 (%p44_p2), %v279_v27 }
  0x38   : > { %v73_v16 = vadd.f32 %v72_v14, %v71_v12  ;;  %249 = vmatprep.subr.bf16.mxu0 (%p44_p2), %v368_v0 }
  0x39   : > { %v67_v17 = vrot.slane %v66_v15, 1 }
  0x3a   : > { %v74_v18 = vrot.slane %v73_v16, 1 }
  0x3b   : > { %v68_v20 = vadd.f32 %v67_v17, %v66_v15  ;;  %46 = sbr.rel (!%p44_p2) target bundleno = 40 (0x28), region = 44  ;;  %250 = vmatpush3.bf16.msra.mxu0 (%p44_p2), %v280_v28 }
  0x3c   : > { %v75_v21 = vadd.f32 %v74_v18, %v73_v16  ;;  %251 = vmatprep.subr.bf16.mxu0 (%p44_p2), %v368_v0 }
  0x3e   : > { %v79_v22 = vsel %vm78_vm0, %v75_v21, %v68_v20 }
  0x3f   : > { %v81_v23 = vadd.f32 %v79_v22, %v57_v19  ;;  %252 = vmatpush3.bf16.msra.mxu0 (%p44_p2), %v281_v29 }
  0x40   :  { %253 = vmatprep.subr.bf16.mxu0 (%p44_p2), %v368_v0 }
  0x41   : > { %82 = vst [vmem:[#allocation2] sm:$0x3] %v81_v23 }
  0x43   :  { %254 = vmatpush3.bf16.msra.mxu0 %v282_v30 }
  0x44   :  { %255 = vmatprep.subr.bf16.mxu0 %v368_v0 }
  0x47   :  { %256 = vmatpush3.bf16.msra.mxu0 %v283_v31 }
  0x48   :  { %v83_v32 = vld [vmem:[#allocation2] sm:$0x3] }
  0x49   :  { %v84_v33 = vpack.c.bf16 %v83_v32, %v83_v32 }
  0x4b   :  { %258 = vmatmul.mubr.bf16.vlgmr.msra.gmra.mrb[0].mxu0 %v84_v33 }
 0x11e   :  { %v183_v34 = vpop.f32.mrb[0].mxu0 }
 0x11f   :  { %189 = vst [vmem:[#allocation8] sm:$0x3] %v183_v34  ;;  %v259_v35 = vpop.f32.mrb[1].mxu0 }
 0x120   :  { %v186_v36 = vpop.f32.mrb[2].mxu0 }
 0x121   :  { %339 = shalt.err (!%p336_p7)
}
 0x122   :  { %s340_s15 = scalar_lea.hbm %s443_s2, 32 }
 0x123   :  { %p341_p8 = scmp.ne.s32.totalorder %s443_s2, %s340_s15  ;;  %p344_p9 = scmp.lt.u32.totalorder %s340_s15, %s443_s2 }
 0x125   :  { %p346_p10 = pnand %p344_p9, %p341_p8 }
 0x127   :  { %349 = shalt.err (!%p346_p10)
}
 0x128   :  { %199 = dma.vmem_to_hbm [thread:$0]  %s197_s11, 32, %s443_s2, [#allocation5]   ;;  %v260_v37 = vpop.f32.mrb[3].mxu0 }
 0x129   :  { %358 = dma.done.wait [#allocation5], 32  }
 0x12a   :  { %359 = vsyncadd [#allocation5], 4294967264 }
 0x12b   :  { %203 = vsyncpa [#allocation4], 1 }
 0x12c   :  { %204 = vsyncpa [#allocation7], 1 }
 0x12d   :  { %205 = vsyncpa [#allocation5], 1 }

// kernel: tpu_custom_call.1
= control target key start
LH: loop header
LB: loop body
LE: loop exit
PB: predicated region body
PF: predicated region fallthrough
CT: control target
= control target key end

     0   :  { %7 = vsyncpa [#allocation4], 0  ;;  %s441_s0 = inlined_call_operand.hbm [shape: bf16[2,64,128], index: 0, kind: input, shape index: {}]   ;;  %s442_s1 = inlined_call_operand.hbm [shape: bf16[128,128], index: 1, kind: input, shape index: {}]   ;;  %s443_s2 = inlined_call_operand.hbm [shape: f32[2,128], index: 2, kind: output, shape index: {}]  }
   0x1   :  { %8 = vsyncpa [#allocation7], 0 }
   0x2   :  { %9 = vsyncpa [#allocation5], 0  ;;  %s364_s9 = smov [#allocation3]   ;;  %s284_s13 = scalar_lea.hbm %s441_s0, 1024 }
   0x3   :  { %s15_s10 = sshll.u32 %s364_s9, 4  ;;  %p285_p0 = scmp.ne.s32.totalorder %s441_s0, %s284_s13  ;;  %s16_s10 = int_to_ptr.vmem [resolvable:$true] %s15_s10 }
   0x4   :  { %p288_p1 = scmp.lt.u32.totalorder %s284_s13, %s441_s0 }
   0x6   :  { %p290_p2 = pnand %p288_p1, %p285_p0 }
   0x8   :  { %293 = shalt.err (!%p290_p2)
}
   0x9   :  { %s294_s18 = scalar_lea.vmem %s16_s10, 1024  ;;  %p299_p4 = scmp.lt.s32.totalorder %s16_s10, %s16_s10 }
   0xa   :  { %p295_p3 = scmp.ne.s32.totalorder %s16_s10, %s294_s18  ;;  %p300_p5 = scmp.lt.s32.totalorder %s294_s18, %s294_s18 }
   0xc   :  { %p301_p6 = por %p300_p5, %p299_p4 }
   0xe   :  { %p302_p7 = pnand %p301_p6, %p295_p3 }
  0x10   :  { %305 = shalt.err (!%p302_p7)
}
  0x11   :  { %s365_s19 = smov 64   ;;  %s366_s20 = smov 4  }
  0x12   :  { %21 = dma.hbm_to_vmem [thread:$0]  %s441_s0, 1024, %s16_s10, [#allocation4], %s365_s19, %s365_s19, %s366_s20  }
  0x13   :  { %s367_s23 = smov [#allocation6]   ;;  %s306_s27 = scalar_lea.hbm %s442_s1, 1024 }
  0x14   :  { %s27_s24 = sshll.u32 %s367_s23, 4  ;;  %p307_p8 = scmp.ne.s32.totalorder %s442_s1, %s306_s27  ;;  %s28_s24 = int_to_ptr.vmem [resolvable:$true] %s27_s24 }
  0x15   :  { %p310_p9 = scmp.lt.u32.totalorder %s306_s27, %s442_s1 }
  0x17   :  { %p312_p10 = pnand %p310_p9, %p307_p8 }
  0x19   :  { %315 = shalt.err (!%p312_p10)
}
  0x1a   :  { %s316_s4 = scalar_lea.vmem %s28_s24, 1024  ;;  %p321_p12 = scmp.lt.s32.totalorder %s28_s24, %s28_s24 }
  0x1b   :  { %p317_p11 = scmp.ne.s32.totalorder %s28_s24, %s316_s4  ;;  %p322_p13 = scmp.lt.s32.totalorder %s316_s4, %s316_s4 }
  0x1d   :  { %p323_p0 = por %p322_p13, %p321_p12 }
  0x1f   :  { %p324_p1 = pnand %p323_p0, %p317_p11 }
  0x21   :  { %327 = shalt.err (!%p324_p1)
}
  0x22   :  { %33 = dma.hbm_to_vmem [thread:$0]  %s442_s1, 1024, %s28_s24, [#allocation7], %s365_s19, %s365_s19, %s366_s20  }
  0x23   :  { %354 = dma.done.wait [#allocation4], 1024  }
  0x24   :  { %355 = vsyncadd [#allocation4], 4294966272 }
  0x25   :  { %356 = dma.done.wait [#allocation7], 1024  }
  0x26   :  { %357 = vsyncadd [#allocation7], 4294966272  ;;  %v368_v0 = vmov 0.0   ;;  %s411_s6 = smov 0  }
  0x27   :  { %41 = vst [vmem:[#allocation2] sm:$0x3] %v368_v0 }
  0x28 LB: > { %s213_s7 = sshll.u32 %s362_s6, 4  ;;  %vm78_vm0 = vcmask 1041409   ;;  %s47_s6 = sadd.s32 1, %s362_s6   ;;  %s362_s6 = sphi %s411_s6, %s47_s6  }
  0x29   : > { %s49_s8 = sshra.s32 %s213_s7, 3  ;;  %p44_p2 = scmp.ge.s32.totalorder %s47_s6, 4  }
  0x2a   : > { %s214_s9 = sshll.u32 %s49_s8, 2  ;;  %241 = vmatprep.subr.bf16.mxu0 (%p44_p2), %v368_v0  ;;  %v276_v24 = vld [vmem:[#allocation6] sm:$0xff] (%p44_p2)   ;;  %vm369_vm1 = vmmov (%p44_p2), 0   ;;  %v277_v25 = vld [vmem:[#allocation6 + $0x8] sm:$0xff] (%p44_p2)   ;;  %v278_v26 = vld [vmem:[#allocation6 + $0x10] sm:$0xff] (%p44_p2)   ;;  %s370_s1 = smov (%p44_p2), [#allocation8]  }
  0x2b   : > { %s52_s10 = scalar_lea.vmem [#allocation3], %s214_s9  ;;  %257 = vmatprep.mubr.msk.bf16.mxu0 (%p44_p2), %vm369_vm1, %v368_v0  ;;  %242 = vmatpush3.bf16.msra.mxu0 (%p44_p2), %v276_v24  ;;  %v279_v27 = vld [vmem:[#allocation6 + $0x18] sm:$0xff] (%p44_p2)   ;;  %v280_v28 = vld [vmem:[#allocation6 + $0x20] sm:$0xff] (%p44_p2)   ;;  %v281_v29 = vld [vmem:[#allocation6 + $0x28] sm:$0xff] (%p44_p2)   ;;  %s196_s11 = sshll.u32 (%p44_p2), %s370_s1, 4  ;;  %s197_s11 = int_to_ptr.vmem [resolvable:$true] %s196_s11 }
  0x2c   : > { %v224_v1 = vld [vmem:[%s52_s10] sm:$0xff]   ;;  %243 = vmatprep.subr.bf16.mxu0 (%p44_p2), %v368_v0  ;;  %v282_v30 = vld [vmem:[#allocation6 + $0x30] sm:$0xff] (%p44_p2)   ;;  %s328_s12 = scalar_lea.vmem (%p44_p2), %s197_s11, 32  ;;  %p333_p4 = scmp.lt.s32.totalorder (%p44_p2), %s197_s11, %s197_s11 }
  0x2d   : > { %v231_v2 = vld [vmem:[%s52_s10 + $0x20] sm:$0xff]   ;;  %v225_v3 = vunpack.c.l.bf16 %v224_v1  ;;  %v226_v4 = vunpack.c.h.bf16 %v224_v1  ;;  %p329_p3 = scmp.ne.s32.totalorder (%p44_p2), %s197_s11, %s328_s12  ;;  %p334_p5 = scmp.lt.s32.totalorder (%p44_p2), %s328_s12, %s328_s12 }
  0x2e   : > { %v229_v5 = vunpack.c.l.bf16 %v231_v2  ;;  %v230_v6 = vunpack.c.h.bf16 %v231_v2  ;;  %v57_v19 = vld [vmem:[#allocation2] sm:$0x3] }
  0x2f   : > { %v62_v7 = vadd.f32 %v226_v4, %v225_v3  ;;  %244 = vmatpush3.bf16.msra.mxu0 (%p44_p2), %v277_v25  ;;  %v283_v31 = vld [vmem:[#allocation6 + $0x38] sm:$0xff] (%p44_p2)   ;;  %p335_p6 = por (%p44_p2), %p334_p5, %p333_p4 }
  0x30   : > { %v69_v8 = vadd.f32 %v230_v6, %v229_v5  ;;  %245 = vmatprep.subr.bf16.mxu0 (%p44_p2), %v368_v0 }
  0x31   : > { %v63_v9 = vrot.slane %v62_v7, 4  ;;  %p336_p7 = pnand (%p44_p2), %p335_p6, %p329_p3 }
  0x32   : > { %v70_v10 = vrot.slane %v69_v8, 4 }
  0x33   : > { %v64_v11 = vadd.f32 %v63_v9, %v62_v7  ;;  %246 = vmatpush3.bf16.msra.mxu0 (%p44_p2), %v278_v26 }
  0x34   : > { %v71_v12 = vadd.f32 %v70_v10, %v69_v8  ;;  %247 = vmatprep.subr.bf16.mxu0 (%p44_p2), %v368_v0 }
  0x35   : > { %v65_v13 = vrot.slane %v64_v11, 2 }
  0x36   : > { %v72_v14 = vrot.slane %v71_v12, 2 }
  0x37   : > { %v66_v15 = vadd.f32 %v65_v13, %v64_v11  ;;  %248 = vmatpush3.bf16.msra.mxu0 (%p44_p2), %v279_v27 }
  0x38   : > { %v73_v16 = vadd.f32 %v72_v14, %v71_v12  ;;  %249 = vmatprep.subr.bf16.mxu0 (%p44_p2), %v368_v0 }
  0x39   : > { %v67_v17 = vrot.slane %v66_v15, 1 }
  0x3a   : > { %v74_v18 = vrot.slane %v73_v16, 1 }
  0x3b   : > { %v68_v20 = vadd.f32 %v67_v17, %v66_v15  ;;  %46 = sbr.rel (!%p44_p2) target bundleno = 40 (0x28), region = 44  ;;  %250 = vmatpush3.bf16.msra.mxu0 (%p44_p2), %v280_v28 }
  0x3c   : > { %v75_v21 = vadd.f32 %v74_v18, %v73_v16  ;;  %251 = vmatprep.subr.bf16.mxu0 (%p44_p2), %v368_v0 }
  0x3e   : > { %v79_v22 = vsel %vm78_vm0, %v75_v21, %v68_v20 }
  0x3f   : > { %v81_v23 = vadd.f32 %v79_v22, %v57_v19  ;;  %252 = vmatpush3.bf16.msra.mxu0 (%p44_p2), %v281_v29 }
  0x40   :  { %253 = vmatprep.subr.bf16.mxu0 (%p44_p2), %v368_v0 }
  0x41   : > { %82 = vst [vmem:[#allocation2] sm:$0x3] %v81_v23 }
  0x43   :  { %254 = vmatpush3.bf16.msra.mxu0 %v282_v30 }
  0x44   :  { %255 = vmatprep.subr.bf16.mxu0 %v368_v0 }
  0x47   :  { %256 = vmatpush3.bf16.msra.mxu0 %v283_v31 }
  0x48   :  { %v83_v32 = vld [vmem:[#allocation2] sm:$0x3] }
  0x49   :  { %v84_v33 = vpack.c.bf16 %v83_v32, %v83_v32 }
  0x4b   :  { %258 = vmatmul.mubr.bf16.vlgmr.msra.gmra.mrb[0].mxu0 %v84_v33 }
 0x11e   :  { %v183_v34 = vpop.f32.mrb[0].mxu0 }
 0x11f   :  { %189 = vst [vmem:[#allocation8] sm:$0x3] %v183_v34  ;;  %v259_v35 = vpop.f32.mrb[1].mxu0 }
 0x120   :  { %v186_v36 = vpop.f32.mrb[2].mxu0 }
 0x121   :  { %339 = shalt.err (!%p336_p7)
}
 0x122   :  { %s340_s15 = scalar_lea.hbm %s443_s2, 32 }
 0x123   :  { %p341_p8 = scmp.ne.s32.totalorder %s443_s2, %s340_s15  ;;  %p344_p9 = scmp.lt.u32.totalorder %s340_s15, %s443_s2 }
 0x125   :  { %p346_p10 = pnand %p344_p9, %p341_p8 }
 0x127   :  { %349 = shalt.err (!%p346_p10)
}
 0x128   :  { %199 = dma.vmem_to_hbm [thread:$0]  %s197_s11, 32, %s443_s2, [#allocation5]   ;;  %v260_v37 = vpop.f32.mrb[3].mxu0 }
 0x129   :  { %358 = dma.done.wait [#allocation5], 32  }
 0x12a   :  { %359 = vsyncadd [#allocation5], 4294967264 }
 0x12b   :  { %203 = vsyncpa [#allocation4], 1 }
 0x12c   :  { %204 = vsyncpa [#allocation7], 1 }
 0x12d   :  { %205 = vsyncpa [#allocation5], 1 }

</bundles_post_ra>
